<compile_context>
chip_gen: v7x
topology: tpu7x:2x2x1
jax: 0.10.0
libtpu: 0.0.40
codegen_flags: <defaults>
</compile_context>

<pallas_src>
import functools

import jax
import jax.numpy as jnp
from jax.experimental import pallas as pl
from jax.experimental.pallas import tpu as pltpu

IN_FEATURES = 28 * 28      # 784
HIDDEN = 60
OUT = 10
HIDDEN_PAD = 128           # lane-dense hidden dim
OUT_PAD = 128              # lane-dense logit dim


def lenet_kernel(x_ref, w1_ref, b1_ref, w2_ref, b2_ref, o_ref):
    # x_ref: (TB, 784) bf16, w1_ref: (784, 128) bf16, b1_ref: (1, 128) f32,
    # w2_ref: (128, 128) bf16, b2_ref: (1, 128) f32, o_ref: (TB, 128) f32
    x = x_ref[...]

    # fc1 + relu (MXU bf16 in, f32 accumulate). Padded hidden cols stay exactly 0.
    h = jnp.dot(x, w1_ref[...], preferred_element_type=jnp.float32) + b1_ref[...]
    h = jnp.maximum(h, 0.0)

    # fc2 + relu. Padded logit cols stay exactly 0 (zero rows/cols in w2p, zero b2p).
    z = jnp.dot(h.astype(jnp.bfloat16), w2_ref[...],
                preferred_element_type=jnp.float32) + b2_ref[...]
    z = jnp.maximum(z, 0.0)

    # log_softmax over the real 10 logits only; padded columns are excluded from max/sum.
    col = jax.lax.broadcasted_iota(jnp.int32, z.shape, 1)
    valid = col < OUT
    z_masked = jnp.where(valid, z, -jnp.inf)
    m = jnp.max(z_masked, axis=-1, keepdims=True)
    s = z - m
    lse = jnp.log(jnp.sum(jnp.where(valid, jnp.exp(s), 0.0), axis=-1, keepdims=True))
    o_ref[...] = s - lse


@functools.partial(jax.jit, static_argnames=("tb",))
def lenet_forward(x, w1, b1, w2, b2, *, tb=1024):
    """x: (B, 1, 28, 28). w1: (784, 60), b1: (1, 60), w2: (60, 10), b2: (1, 10).
    Returns (B, 10) log-probabilities (float32)."""
    B = x.shape[0]
    x_flat = x.reshape(B, -1)  # matches torch.flatten(x, 1), row-major

    # --- pad weights to lane-dense shapes, cast matmul operands to bf16 ---
    w1p = jnp.zeros((IN_FEATURES, HIDDEN_PAD), jnp.bfloat16).at[:, :HIDDEN].set(
        w1.astype(jnp.bfloat16))
    b1p = jnp.zeros((1, HIDDEN_PAD), jnp.float32).at[:, :HIDDEN].set(
        b1.astype(jnp.float32))
    w2p = jnp.zeros((HIDDEN_PAD, OUT_PAD), jnp.bfloat16).at[:HIDDEN, :OUT].set(
        w2.astype(jnp.bfloat16))
    b2p = jnp.zeros((1, OUT_PAD), jnp.float32).at[:, :OUT].set(
        b2.astype(jnp.float32))

    # --- batch tiling: tile must be a multiple of 8 (sublane); pad B up to a multiple of it ---
    tb = max(8, min(tb, ((B + 7) // 8) * 8))
    bp = ((B + tb - 1) // tb) * tb
    xp = jnp.zeros((bp, IN_FEATURES), jnp.bfloat16).at[:B].set(
        x_flat.astype(jnp.bfloat16))

    grid = (bp // tb,)

    weight_bytes = (w1p.size + w2p.size) * 2 + (b1p.size + b2p.size) * 4
    cost = pl.CostEstimate(
        flops=2 * bp * (IN_FEATURES * HIDDEN_PAD + HIDDEN_PAD * OUT_PAD),
        transcendentals=bp * OUT_PAD,
        bytes_accessed=bp * IN_FEATURES * 2 + bp * OUT_PAD * 4 + weight_bytes,
    )

    out_padded = pl.pallas_call(
        lenet_kernel,
        out_shape=jax.ShapeDtypeStruct((bp, OUT_PAD), jnp.float32),
        grid_spec=pltpu.PrefetchScalarGridSpec(
            num_scalar_prefetch=0,
            grid=grid,
            in_specs=[
                pl.BlockSpec((tb, IN_FEATURES), lambda i: (i, 0)),   # x stream
                pl.BlockSpec((IN_FEATURES, HIDDEN_PAD), lambda i: (0, 0)),  # resident
                pl.BlockSpec((1, HIDDEN_PAD), lambda i: (0, 0)),
                pl.BlockSpec((HIDDEN_PAD, OUT_PAD), lambda i: (0, 0)),
                pl.BlockSpec((1, OUT_PAD), lambda i: (0, 0)),
            ],
            out_specs=pl.BlockSpec((tb, OUT_PAD), lambda i: (i, 0)),
        ),
        compiler_params=pltpu.CompilerParams(
            dimension_semantics=("parallel",),  # v7x: shard batch tiles across both TCs
        ),
        cost_estimate=cost,
    )(xp, w1p, b1p, w2p, b2p)

    return out_padded[:B, :OUT]


def init_params(key):
    # Deterministic init mimicking nn.Linear's uniform(-1/sqrt(fan_in), 1/sqrt(fan_in)).
    k1, k2, k3, k4 = jax.random.split(key, 4)
    bound1 = 1.0 / (IN_FEATURES ** 0.5)
    bound2 = 1.0 / (HIDDEN ** 0.5)
    # Stored as (in, out) — transposed relative to PyTorch's (out, in).
    w1 = jax.random.uniform(k1, (IN_FEATURES, HIDDEN), jnp.float32, -bound1, bound1)
    b1 = jax.random.uniform(k2, (1, HIDDEN), jnp.float32, -bound1, bound1)
    w2 = jax.random.uniform(k3, (HIDDEN, OUT), jnp.float32, -bound2, bound2)
    b2 = jax.random.uniform(k4, (1, OUT), jnp.float32, -bound2, bound2)
    return w1, b1, w2, b2


def _reference(x, w1, b1, w2, b2):
    # Pure-JAX f32 reference of the PyTorch forward pass.
    xf = x.reshape(x.shape[0], -1)
    h = jnp.maximum(xf @ w1 + b1, 0.0)
    z = jnp.maximum(h @ w2 + b2, 0.0)
    return jax.nn.log_softmax(z, axis=-1)


if __name__ == "__main__":
    key = jax.random.PRNGKey(0)
    kx, kp = jax.random.split(key)

    B = 2
    x = jax.random.normal(kx, (B, 1, 28, 28), jnp.float32)
    w1, b1, w2, b2 = init_params(kp)

    out = lenet_forward(x, w1, b1, w2, b2)
    out = jax.block_until_ready(out)

    assert out.shape == (B, OUT)

    # sanity: log_softmax rows should sum (in prob space) to ~1
    probs_sum = jnp.sum(jnp.exp(out), axis=-1)
    assert jnp.allclose(probs_sum, jnp.ones((B,)), atol=1e-4), probs_sum

    # loose check vs f32 reference (kernel uses bf16 matmul operands)
    ref = _reference(x, w1, b1, w2, b2)
    assert jnp.allclose(out, ref, atol=1e-1), jnp.max(jnp.abs(out - ref))

    print("KERNEL_OK")
</pallas_src>

<mosaic_0001>
module attributes {stable_mosaic.version = 11 : i64} {
  func.func @lenet_kernel(%arg0: i32, %arg1: memref<8x784xbf16, #tpu.memory_space<vmem>>, %arg2: memref<784x128xbf16, #tpu.memory_space<vmem>>, %arg3: memref<1x128xf32, #tpu.memory_space<vmem>>, %arg4: memref<128x128xbf16, #tpu.memory_space<vmem>>, %arg5: memref<1x128xf32, #tpu.memory_space<vmem>>, %arg6: memref<8x128xf32, #tpu.memory_space<vmem>>) attributes {dimension_semantics = [#tpu.dimension_semantics<parallel>], iteration_bounds = array<i64: 1>, scalar_prefetch = 0 : i64, scratch_operands = 0 : i64, tpu.core_type = #tpu.core_type<tc>, window_params = [{transform_indices = @transform_0, window_bounds = array<i64: 8, 784>}, {pipeline_mode = #tpu.pipeline_mode<synchronous>, transform_indices = @transform_1, window_bounds = array<i64: 784, 128>}, {pipeline_mode = #tpu.pipeline_mode<synchronous>, transform_indices = @transform_2, window_bounds = array<i64: 1, 128>}, {pipeline_mode = #tpu.pipeline_mode<synchronous>, transform_indices = @transform_3, window_bounds = array<i64: 128, 128>}, {pipeline_mode = #tpu.pipeline_mode<synchronous>, transform_indices = @transform_4, window_bounds = array<i64: 1, 128>}, {transform_indices = @transform_5, window_bounds = array<i64: 8, 128>}]} {
    %c0 = arith.constant 0 : index
    %c0_0 = arith.constant 0 : index
    %0 = vector.load %arg1[%c0, %c0_0] : memref<8x784xbf16, #tpu.memory_space<vmem>>, vector<8x784xbf16>
    %c0_1 = arith.constant 0 : index
    %c0_2 = arith.constant 0 : index
    %1 = vector.load %arg2[%c0_1, %c0_2] : memref<784x128xbf16, #tpu.memory_space<vmem>>, vector<784x128xbf16>
    %cst = arith.constant dense<0.000000e+00> : vector<8x128xf32>
    %2 = tpu.matmul %0, %1, %cst {dimension_numbers = #tpu.dot_dimension_numbers<[1], [0], [0], [1], [0, 0, 1, 1], [], []>} : vector<8x784xbf16>, vector<784x128xbf16>, vector<8x128xf32> -> vector<8x128xf32>
    %c0_3 = arith.constant 0 : index
    %c0_4 = arith.constant 0 : index
    %3 = vector.load %arg3[%c0_3, %c0_4] : memref<1x128xf32, #tpu.memory_space<vmem>>, vector<1x128xf32>
    %4 = vector.broadcast %3 : vector<1x128xf32> to vector<8x128xf32>
    %5 = arith.addf %2, %4 : vector<8x128xf32>
    %cst_5 = arith.constant 0.000000e+00 : f32
    %6 = vector.broadcast %cst_5 : f32 to vector<8x128xf32>
    %7 = arith.maximumf %5, %6 : vector<8x128xf32>
    %8 = arith.truncf %7 : vector<8x128xf32> to vector<8x128xbf16>
    %c0_6 = arith.constant 0 : index
    %c0_7 = arith.constant 0 : index
    %9 = vector.load %arg4[%c0_6, %c0_7] : memref<128x128xbf16, #tpu.memory_space<vmem>>, vector<128x128xbf16>
    %cst_8 = arith.constant dense<0.000000e+00> : vector<8x128xf32>
    %10 = tpu.matmul %8, %9, %cst_8 {dimension_numbers = #tpu.dot_dimension_numbers<[1], [0], [0], [1], [0, 0, 1, 1], [], []>} : vector<8x128xbf16>, vector<128x128xbf16>, vector<8x128xf32> -> vector<8x128xf32>
    %c0_9 = arith.constant 0 : index
    %c0_10 = arith.constant 0 : index
    %11 = vector.load %arg5[%c0_9, %c0_10] : memref<1x128xf32, #tpu.memory_space<vmem>>, vector<1x128xf32>
    %12 = vector.broadcast %11 : vector<1x128xf32> to vector<8x128xf32>
    %13 = arith.addf %10, %12 : vector<8x128xf32>
    %cst_11 = arith.constant 0.000000e+00 : f32
    %14 = vector.broadcast %cst_11 : f32 to vector<8x128xf32>
    %15 = arith.maximumf %13, %14 : vector<8x128xf32>
    %16 = tpu.iota {dimensions = array<i32: 1>} : vector<8x128xi32>
    %c10_i32 = arith.constant 10 : i32
    %17 = vector.broadcast %c10_i32 : i32 to vector<8x128xi32>
    %18 = arith.cmpi slt, %16, %17 : vector<8x128xi32>
    %cst_12 = arith.constant 0xFF800000 : f32
    %19 = vector.broadcast %cst_12 : f32 to vector<8x128xf32>
    %20 = arith.select %18, %15, %19 : vector<8x128xi1>, vector<8x128xf32>
    %cst_13 = arith.constant dense<0xFF800000> : vector<8xf32>
    %21 = vector.multi_reduction <maximumf>, %20, %cst_13 [1] : vector<8x128xf32> to vector<8xf32>
    %22 = vector.shape_cast %21 : vector<8xf32> to vector<8x1xf32>
    %23 = vector.broadcast %22 : vector<8x1xf32> to vector<8x128xf32>
    %24 = arith.subf %15, %23 : vector<8x128xf32>
    %25 = math.exp %24 : vector<8x128xf32>
    %cst_14 = arith.constant 0.000000e+00 : f32
    %26 = vector.broadcast %cst_14 : f32 to vector<8x128xf32>
    %27 = arith.select %18, %25, %26 : vector<8x128xi1>, vector<8x128xf32>
    %cst_15 = arith.constant dense<0.000000e+00> : vector<8xf32>
    %28 = vector.multi_reduction <add>, %27, %cst_15 [1] : vector<8x128xf32> to vector<8xf32>
    %29 = vector.shape_cast %28 : vector<8xf32> to vector<8x1xf32>
    %30 = math.log %29 : vector<8x1xf32>
    %31 = vector.broadcast %30 : vector<8x1xf32> to vector<8x128xf32>
    %32 = arith.subf %24, %31 : vector<8x128xf32>
    %c0_16 = arith.constant 0 : index
    %c0_17 = arith.constant 0 : index
    %33 = vector.load %arg6[%c0_16, %c0_17] : memref<8x128xf32, #tpu.memory_space<vmem>>, vector<8x128xf32>
    tpu.vector_store %arg6[%c0_16, %c0_17], %32 {strides = array<i32>} : memref<8x128xf32, #tpu.memory_space<vmem>>, vector<8x128xf32>,
    return
  }
  func.func @transform_0(%arg0: i32) -> (i32, i32) {
    %c0_i32 = arith.constant 0 : i32
    %c0_i32_0 = arith.constant 0 : i32
    return %arg0, %c0_i32 : i32, i32
  }
  func.func @transform_1(%arg0: i32) -> (i32, i32) {
    %c0_i32 = arith.constant 0 : i32
    %c0_i32_0 = arith.constant 0 : i32
    %c0_i32_1 = arith.constant 0 : i32
    return %c0_i32, %c0_i32_0 : i32, i32
  }
  func.func @transform_2(%arg0: i32) -> (i32, i32) {
    %c0_i32 = arith.constant 0 : i32
    %c0_i32_0 = arith.constant 0 : i32
    %c0_i32_1 = arith.constant 0 : i32
    return %c0_i32, %c0_i32_0 : i32, i32
  }
  func.func @transform_3(%arg0: i32) -> (i32, i32) {
    %c0_i32 = arith.constant 0 : i32
    %c0_i32_0 = arith.constant 0 : i32
    %c0_i32_1 = arith.constant 0 : i32
    return %c0_i32, %c0_i32_0 : i32, i32
  }
  func.func @transform_4(%arg0: i32) -> (i32, i32) {
    %c0_i32 = arith.constant 0 : i32
    %c0_i32_0 = arith.constant 0 : i32
    %c0_i32_1 = arith.constant 0 : i32
    return %c0_i32, %c0_i32_0 : i32, i32
  }
  func.func @transform_5(%arg0: i32) -> (i32, i32) {
    %c0_i32 = arith.constant 0 : i32
    %c0_i32_0 = arith.constant 0 : i32
    return %arg0, %c0_i32 : i32, i32
  }
}

</mosaic_0001>

<bundles_post_ra>
// kernel: lenet_forward.1
= control target key start
LH: loop header
LB: loop body
LE: loop exit
PB: predicated region body
PF: predicated region fallthrough
CT: control target
= control target key end

     0   :  { %v986_v41 = vmov 0.0   ;;  %vm987_vm0 = vmmov 0   ;;  %vm448_vm1 = vcmask 130048   ;;  %s1223_s1 = inlined_call_operand.vmem [shape: bf16[784,128], index: 1, kind: input, shape index: {}]   ;;  %s1224_s0 = inlined_call_operand.vmem [shape: bf16[8,784], index: 0, kind: input, shape index: {}]   ;;  %s1225_s3 = inlined_call_operand.vmem [shape: bf16[128,128], index: 3, kind: input, shape index: {}]   ;;  %s1226_s2 = inlined_call_operand.vmem [shape: f32[1,128], index: 2, kind: input, shape index: {}]   ;;  %s1227_s4 = inlined_call_operand.vmem [shape: f32[1,128], index: 4, kind: input, shape index: {}]   ;;  %s1228_s5 = inlined_call_operand.vmem [shape: f32[8,128], index: 5, kind: output, shape index: {}]  }
   0x1   :  { %v918_v0 = vld [vmem:[%s1223_s1 + $0x40] sm:$0xff]   ;;  %v922_v4 = vld [vmem:[%s1223_s1 + $0x48] sm:$0xff]   ;;  %v926_v8 = vld [vmem:[%s1223_s1 + $0x50] sm:$0xff]  }
   0x2   :  { %v919_v1 = vld [vmem:[%s1223_s1] sm:$0xff]   ;;  %813 = vmatprep.subr.bf16.mxu0 %v918_v0  ;;  %v923_v5 = vld [vmem:[%s1223_s1 + $0x8] sm:$0xff]   ;;  %v927_v9 = vld [vmem:[%s1223_s1 + $0x10] sm:$0xff]  }
   0x3   :  { %v920_v2 = vld [vmem:[%s1223_s1 + $0xc0] sm:$0xff]   ;;  %814 = vmatpush3.bf16.msra.mxu0 %v919_v1  ;;  %v924_v6 = vld [vmem:[%s1223_s1 + $0xc8] sm:$0xff]   ;;  %v928_v10 = vld [vmem:[%s1223_s1 + $0xd0] sm:$0xff]  }
   0x4   :  { %v921_v3 = vld [vmem:[%s1223_s1 + $0x80] sm:$0xff]   ;;  %835 = vmatprep.subr.bf16.mxu1 %v920_v2  ;;  %815 = vmatprep.subr.bf16.mxu0 %v922_v4  ;;  %v925_v7 = vld [vmem:[%s1223_s1 + $0x88] sm:$0xff]   ;;  %v929_v11 = vld [vmem:[%s1223_s1 + $0x90] sm:$0xff]  }
   0x5   :  { %836 = vmatpush3.bf16.msra.mxu1 %v921_v3  ;;  %v930_v12 = vld [vmem:[%s1223_s1 + $0x58] sm:$0xff]   ;;  %v934_v16 = vld [vmem:[%s1223_s1 + $0x60] sm:$0xff]   ;;  %v938_v20 = vld [vmem:[%s1223_s1 + $0x68] sm:$0xff]  }
   0x6   :  { %837 = vmatprep.subr.bf16.mxu1 %v924_v6  ;;  %v931_v13 = vld [vmem:[%s1223_s1 + $0x18] sm:$0xff]   ;;  %v935_v17 = vld [vmem:[%s1223_s1 + $0x20] sm:$0xff]   ;;  %v939_v21 = vld [vmem:[%s1223_s1 + $0x28] sm:$0xff]  }
   0x7   :  { %816 = vmatpush3.bf16.msra.mxu0 %v923_v5  ;;  %v932_v14 = vld [vmem:[%s1223_s1 + $0xd8] sm:$0xff]   ;;  %v936_v18 = vld [vmem:[%s1223_s1 + $0xe0] sm:$0xff]   ;;  %v940_v22 = vld [vmem:[%s1223_s1 + $0xe8] sm:$0xff]  }
   0x8   :  { %817 = vmatprep.subr.bf16.mxu0 %v926_v8  ;;  %v933_v15 = vld [vmem:[%s1223_s1 + $0x98] sm:$0xff]   ;;  %v937_v19 = vld [vmem:[%s1223_s1 + $0xa0] sm:$0xff]   ;;  %v941_v23 = vld [vmem:[%s1223_s1 + $0xa8] sm:$0xff]  }
   0x9   :  { %838 = vmatpush3.bf16.msra.mxu1 %v925_v7  ;;  %v942_v24 = vld [vmem:[%s1223_s1 + $0x70] sm:$0xff]   ;;  %v946_v28 = vld [vmem:[%s1223_s1 + $0x78] sm:$0xff]   ;;  %v21_v31 = vld [vmem:[%s1224_s0] sm:$0xff] }
   0xa   :  { %839 = vmatprep.subr.bf16.mxu1 %v928_v10  ;;  %v943_v25 = vld [vmem:[%s1223_s1 + $0x30] sm:$0xff]   ;;  %v947_v29 = vld [vmem:[%s1223_s1 + $0x38] sm:$0xff]   ;;  %v747_v32 = vcombine.low %v21_v31, %v21_v31  ;;  %v748_v33 = vcombine.high %v21_v31, %v21_v31  ;;  %v953_v35 = vld [vmem:[%s1223_s1 + $0x140] sm:$0xff]  }
   0xb   :  { %818 = vmatpush3.bf16.msra.mxu0 %v927_v9  ;;  %v944_v26 = vld [vmem:[%s1223_s1 + $0xf0] sm:$0xff]   ;;  %v948_v30 = vld [vmem:[%s1223_s1 + $0xf8] sm:$0xff]   ;;  %v22_v36 = vld [vmem:[%s1224_s0 + $0x8] sm:$0xff] }
   0xc   :  { %819 = vmatprep.subr.bf16.mxu0 %v930_v12  ;;  %v945_v27 = vld [vmem:[%s1223_s1 + $0xb0] sm:$0xff]   ;;  %v952_v34 = vld [vmem:[%s1223_s1 + $0xb8] sm:$0xff]   ;;  %484 = vmatprep.mubr.bf16.mxu0 %v748_v33  ;;  %v749_v37 = vcombine.low %v22_v36, %v22_v36  ;;  %v750_v38 = vcombine.high %v22_v36, %v22_v36  ;;  %v956_v39 = vld [vmem:[%s1223_s1 + $0x100] sm:$0xff]  }
   0xd   :  { %840 = vmatpush3.bf16.msra.mxu1 %v929_v11  ;;  %v957_v40 = vld [vmem:[%s1223_s1 + $0x148] sm:$0xff]   ;;  %v959_v43 = vld [vmem:[%s1223_s1 + $0x150] sm:$0xff]   ;;  %v961_v45 = vld [vmem:[%s1223_s1 + $0x158] sm:$0xff]  }
   0xe   :  { %841 = vmatprep.subr.bf16.mxu1 %v932_v14  ;;  %524 = vmatprep.mubr.bf16.mxu1 %v750_v38  ;;  %v958_v42 = vld [vmem:[%s1223_s1 + $0x108] sm:$0xff]   ;;  %v960_v44 = vld [vmem:[%s1223_s1 + $0x110] sm:$0xff]   ;;  %v962_v46 = vld [vmem:[%s1223_s1 + $0x118] sm:$0xff]  }
   0xf   :  { %820 = vmatpush3.bf16.msra.mxu0 %v931_v13  ;;  %v963_v47 = vld [vmem:[%s1223_s1 + $0x160] sm:$0xff]   ;;  %v965_v49 = vld [vmem:[%s1223_s1 + $0x168] sm:$0xff]   ;;  %v23_v51 = vld [vmem:[%s1224_s0 + $0x10] sm:$0xff] }
  0x10   :  { %821 = vmatprep.subr.bf16.mxu0 %v934_v16  ;;  %v964_v48 = vld [vmem:[%s1223_s1 + $0x120] sm:$0xff]   ;;  %v951_v52 = vld [vmem:[%s1224_s0 + $0x18] ss:$0 sps:$4 sm:$0xff]   ;;  %v752_v53 = vcombine.high %v23_v51, %v23_v51  ;;  %v966_v54 = vld [vmem:[%s1223_s1 + $0x128] sm:$0xff]   ;;  %v751_v59 = vcombine.low %v23_v51, %v23_v51 }
  0x11   :  { %842 = vmatpush3.bf16.msra.mxu1 %v933_v15  ;;  %v971_v50 = vld [vmem:[%s1223_s1 + $0x180] sm:$0xff]   ;;  %v967_v55 = vld [vmem:[%s1223_s1 + $0x170] sm:$0xff]   ;;  %v969_v57 = vld [vmem:[%s1223_s1 + $0x178] sm:$0xff]  }
  0x12   :  { %843 = vmatprep.subr.bf16.mxu1 %v936_v18  ;;  %v968_v56 = vld [vmem:[%s1223_s1 + $0x130] sm:$0xff]   ;;  %v970_v58 = vld [vmem:[%s1223_s1 + $0x138] sm:$0xff]   ;;  %v974_v60 = vld [vmem:[%s1225_s3] sm:$0xff]  }
  0x13   :  { %822 = vmatpush3.bf16.msra.mxu0 %v935_v17  ;;  %v975_v61 = vld [vmem:[%s1225_s3 + $0x8] sm:$0xff]   ;;  %v976_v62 = vld [vmem:[%s1225_s3 + $0x10] sm:$0xff]   ;;  %v977_v63 = vld [vmem:[%s1225_s3 + $0x18] sm:$0xff]  }
  0x14   :  { %823 = vmatprep.subr.bf16.mxu0 %v938_v20  ;;  %v978_v0 = vld [vmem:[%s1225_s3 + $0x20] sm:$0xff]   ;;  %v979_v1 = vld [vmem:[%s1225_s3 + $0x28] sm:$0xff]   ;;  %v980_v2 = vld [vmem:[%s1225_s3 + $0x30] sm:$0xff]  }
  0x15   :  { %844 = vmatpush3.bf16.msra.mxu1 %v937_v19  ;;  %v981_v3 = vld [vmem:[%s1225_s3 + $0x38] sm:$0xff]   ;;  %v746_v5 = vld [vmem:[%s1226_s2] ss:$0 sm:$0xff] }
  0x16   :  { %845 = vmatprep.subr.bf16.mxu1 %v940_v22  ;;  %v804_v31 = vld [vmem:[%s1227_s4] ss:$0 sm:$0xff] }
  0x17   :  { %824 = vmatpush3.bf16.msra.mxu0 %v939_v21 }
  0x18   :  { %825 = vmatprep.subr.bf16.mxu0 %v942_v24 }
  0x19   :  { %846 = vmatpush3.bf16.msra.mxu1 %v941_v23 }
  0x1a   :  { %847 = vmatprep.subr.bf16.mxu1 %v944_v26 }
  0x1b   :  { %826 = vmatpush3.bf16.msra.mxu0 %v943_v25 }
  0x1c   :  { %827 = vmatprep.subr.bf16.mxu0 %v946_v28 }
  0x1d   :  { %848 = vmatpush3.bf16.msra.mxu1 %v945_v27 }
  0x1e   :  { %849 = vmatprep.subr.bf16.mxu1 %v948_v30  ;;  %v726_v30 = vlaneseq }
  0x1f   :  { %828 = vmatpush3.bf16.msra.mxu0 %v947_v29 }
  0x20   :  { %857 = vmatprep.subr.bf16.mxu0 %v953_v35 }
  0x21   :  { %850 = vmatpush3.bf16.msra.mxu1 %v952_v34 }
  0x22   :  { %485 = vmatmul.mubr.bf16.vlgmr.msra.gmra.mrb[0].mxu0 %v747_v32  ;;  %890 = vmatprep.subr.bf16.mxu1 %v986_v41  ;;  %v727_v32 = vand.u32 127, %v726_v30 }
  0x23   :  { %858 = vmatpush3.bf16.msra.mxu0 %v956_v39  ;;  %564 = vmatprep.mubr.bf16.mxu0 %v752_v53 }
  0x24   :  { %525 = vmatmul.mubr.bf16.vlgmr.msra.gmra.mrb[0].mxu1 %v749_v37  ;;  %859 = vmatprep.subr.bf16.mxu0 %v957_v40  ;;  %vm728_vm2 = vcmp.lt.s32.totalorder %v727_v32, 10 }
  0x25   :  { %892 = vmatprep.mubr.msk.bf16.mxu1 %vm987_vm0, %v986_v41  ;;  %891 = vmatpush3.bf16.msra.mxu1 %v971_v50 }
  0x26   :  { %896 = vmatprep.subr.bf16.mxu1 %v986_v41 }
  0x27   :  { %860 = vmatpush3.bf16.msra.mxu0 %v958_v42 }
  0x28   :  { %861 = vmatprep.subr.bf16.mxu0 %v959_v43 }
  0x2b   :  { %862 = vmatpush3.bf16.msra.mxu0 %v960_v44 }
  0x2c   :  { %863 = vmatprep.subr.bf16.mxu0 %v961_v45  ;;  %893 = vmatmul.mubr.msk.bf16.vlgmr.msra.gmra.mrb[4].mxu1 %vm448_vm1, %v951_v52 }
  0x2d   :  { %912 = vmatprep.mubr.msk.bf16.mxu1 %vm987_vm0, %v986_v41  ;;  %897 = vmatpush3.bf16.msra.mxu1 %v974_v60 }
  0x2e   :  { %898 = vmatprep.subr.bf16.mxu1 %v986_v41 }
  0x2f   :  { %864 = vmatpush3.bf16.msra.mxu0 %v962_v46 }
  0x30   :  { %865 = vmatprep.subr.bf16.mxu0 %v963_v47 }
  0x31   :  { %899 = vmatpush3.bf16.msra.mxu1 %v975_v61 }
  0x32   :  { %900 = vmatprep.subr.bf16.mxu1 %v986_v41 }
  0x33   :  { %866 = vmatpush3.bf16.msra.mxu0 %v964_v48 }
  0x34   :  { %867 = vmatprep.subr.bf16.mxu0 %v965_v49 }
  0x35   :  { %901 = vmatpush3.bf16.msra.mxu1 %v976_v62 }
  0x36   :  { %902 = vmatprep.subr.bf16.mxu1 %v986_v41 }
  0x37   :  { %868 = vmatpush3.bf16.msra.mxu0 %v966_v54 }
  0x38   :  { %869 = vmatprep.subr.bf16.mxu0 %v967_v55 }
  0x39   :  { %903 = vmatpush3.bf16.msra.mxu1 %v977_v63 }
  0x3a   :  { %904 = vmatprep.subr.bf16.mxu1 %v986_v41 }
  0x3b   :  { %870 = vmatpush3.bf16.msra.mxu0 %v968_v56 }
  0x3c   :  { %871 = vmatprep.subr.bf16.mxu0 %v969_v57 }
  0x3d   :  { %905 = vmatpush3.bf16.msra.mxu1 %v978_v0 }
  0x3e   :  { %906 = vmatprep.subr.bf16.mxu1 %v986_v41 }
  0x3f   :  { %872 = vmatpush3.bf16.msra.mxu0 %v970_v58 }
  0x41   :  { %907 = vmatpush3.bf16.msra.mxu1 %v979_v1 }
  0x42   :  { %565 = vmatmul.mubr.bf16.vlgmr.msra.gmra.mrb[4].mxu0 %v751_v59  ;;  %908 = vmatprep.subr.bf16.mxu1 %v986_v41 }
  0x45   :  { %909 = vmatpush3.bf16.msra.mxu1 %v980_v2 }
  0x46   :  { %910 = vmatprep.subr.bf16.mxu1 %v986_v41 }
  0x49   :  { %911 = vmatpush3.bf16.msra.mxu1 %v981_v3 }
  0xf5   :  { %v829_v4 = vpop.f32.mrb[0].mxu0 }
  0xf6   :  { %v830_v6 = vpop.f32.mrb[1].mxu0 }
  0xf7   :  { %v831_v7 = vadd.f32 %v830_v6, %v829_v4  ;;  %v832_v8 = vpop.f32.mrb[2].mxu0  ;;  %v851_v9 = vpop.f32.mrb[0].mxu1 }
  0xf8   :  { %v833_v10 = vpop.f32.mrb[3].mxu0  ;;  %v852_v12 = vpop.f32.mrb[1].mxu1 }
  0xf9   :  { %v487_v11 = vadd.f32 %v831_v7, %v746_v5  ;;  %v853_v13 = vadd.f32 %v852_v12, %v851_v9  ;;  %v854_v14 = vpop.f32.mrb[2].mxu1 }
  0xfa   :  { %v855_v15 = vpop.f32.mrb[3].mxu1 }
  0xfb   :  { %v527_v16 = vadd.f32 %v853_v13, %v487_v11 }
  0xff   :  { %v606_v17 = vpop.f32.mrb[4].mxu1 }
 0x100   :  { %v894_v18 = vpop.f32.mrb[5].mxu1 }
 0x101   :  { %v609_v19 = vpop.f32.mrb[6].mxu1 }
 0x102   :  { %v895_v20 = vpop.f32.mrb[7].mxu1 }
 0x115   :  { %v873_v21 = vpop.f32.mrb[4].mxu0 }
 0x116   :  { %v874_v22 = vpop.f32.mrb[5].mxu0 }
 0x117   :  { %v875_v23 = vadd.f32 %v874_v22, %v873_v21  ;;  %v876_v24 = vpop.f32.mrb[6].mxu0 }
 0x118   :  { %v877_v25 = vpop.f32.mrb[7].mxu0 }
 0x119   :  { %v567_v26 = vadd.f32 %v875_v23, %v527_v16 }
 0x11b   :  { %v607_v27 = vadd.f32 %v606_v17, %v567_v26 }
 0x11d   :  { %v612_v28 = vmax.f32 %v607_v27, 0.0 }
 0x11f   :  { %v613_v29 = vpack.c.bf16 %v612_v28, %v612_v28 }
 0x121   :  { %913 = vmatmul.mubr.bf16.vlgmr.msra.gmra.mrb[8].mxu1 %v613_v29 }
 0x1f4   :  { %v719_v33 = vpop.f32.mrb[8].mxu1 }
 0x1f5   :  { %v720_v34 = vadd.f32 %v804_v31, %v719_v33  ;;  %v914_v35 = vpop.f32.mrb[9].mxu1 }
 0x1f6   :  { %v722_v36 = vpop.f32.mrb[10].mxu1 }
 0x1f7   :  { %v725_v37 = vmax.f32 %v720_v34, 0.0  ;;  %v915_v38 = vpop.f32.mrb[11].mxu1 }
 0x1f9   :  { %v729_v39 = vsel %vm728_vm2, %v725_v37, -inf }
 0x1fa   :  { %730 = vmax.xlane.f32.xlu0 %v729_v39 }
 0x287   :  { %v731_v40 = vpop.xlane.xlu0 %730 }
 0x288   :  { %v732_v41 = vsub.f32 %v725_v37, %v731_v40 }
 0x28a   :  { %v733_v42 = vmul.f32 1.442695, %v732_v41 }
 0x28c   :  { %982 = vpow2.f32 %v733_v42 }
 0x296   :  { %v983_v43 = vpop.eup %982 }
 0x297   :  { %v735_v44 = vsel %vm728_vm2, %v983_v43, 0.0 }
 0x298   :  { %736 = vadd.xlane.f32.xlu0 %v735_v44 }
 0x325   :  { %v737_v45 = vpop.xlane.xlu0 %736 }
 0x326   :  { %984 = vlog2.f32 %v737_v45 }
 0x330   :  { %v985_v46 = vpop.eup %984 }
 0x331   :  { %v739_v47 = vmul.f32 0.6931472, %v985_v46 }
 0x333   :  { %v740_v48 = vsub.f32 %v732_v41, %v739_v47 }
 0x335   :  { %741 = vst [vmem:[%s1228_s5] sm:$0xff] %v740_v48 }

</bundles_post_ra>
